<compile_context>
chip_gen: v7x
topology: tpu7x:2x2x1
jax: 0.10.0
libtpu: 0.0.40
codegen_flags: <defaults>
</compile_context>

<pallas_src>
import functools
import math

import jax
import jax.numpy as jnp
import numpy as np
from jax.experimental import pallas as pl
from jax.experimental.pallas import tpu as pltpu


def make_positional_encoding(max_len, d_model, dtype=jnp.float32):
    """Matches the PyTorch buffer: pe[p, 2i]=sin(p*w_i), pe[p, 2i+1]=cos(p*w_i).

    Tip: storing the buffer as bfloat16 halves its HBM read stream (values are in
    [-1, 1]); the kernel upcasts it to the activation dtype.
    """
    position = np.arange(max_len, dtype=np.float32)[:, None]
    div_term = np.exp(np.arange(0, d_model, 2, dtype=np.float32)
                      * (-math.log(10000.0) / d_model))
    pe = np.zeros((max_len, d_model), dtype=np.float32)
    pe[:, 0::2] = np.sin(position * div_term)
    pe[:, 1::2] = np.cos(position * div_term)
    return jnp.asarray(pe, dtype)


def _hash_u32(x):
    # splitmix32-style mixer (portable fallback PRNG): elementwise u32 mul/xor/shift.
    x = x * jnp.uint32(0x9E3779B9)
    x = x ^ (x >> jnp.uint32(16))
    x = x * jnp.uint32(0x85EBCA6B)
    x = x ^ (x >> jnp.uint32(13))
    x = x * jnp.uint32(0xC2B2AE35)
    x = x ^ (x >> jnp.uint32(16))
    return x


def pos_enc_kernel(seed_ref, x_ref, pe_ref, o_ref, *, dropout_p, rows_per_batch,
                   tile_rows, lane, use_hw_prng):
    # x_ref / pe_ref / o_ref: (tile_rows, lane) tiles (batch dim squeezed by BlockSpec).
    x = x_ref[...]
    y = x + pe_ref[...].astype(x.dtype)        # compute in the activation dtype

    if dropout_p > 0.0:
        tr, ln = y.shape
        if use_hw_prng:
            # Hardware PRNG (~1 op/element). Reseed per grid step so the mask depends
            # only on (seed, row_block, batch), not on megacore scheduling.
            pltpu.prng_seed(seed_ref[0], pl.program_id(0), pl.program_id(1))
            padded = ((tr + 7) // 8) * 8       # keep the PRNG draw sublane-aligned
            bits = pltpu.prng_random_bits((padded, ln))
            if bits.dtype != jnp.uint32:
                bits = pltpu.bitcast(bits, jnp.uint32)
            bits = bits[:tr, :]
        else:
            # Portable counter-hash fallback: keyed on the flat global element index,
            # hence deterministic and tiling-invariant. (Counter wraps if
            # B*S*D >= 2^32 — asserted in the wrapper.)
            j = pl.program_id(0).astype(jnp.uint32)
            b = pl.program_id(1).astype(jnp.uint32)
            r = jax.lax.broadcasted_iota(jnp.uint32, y.shape, 0)
            c = jax.lax.broadcasted_iota(jnp.uint32, y.shape, 1)
            row = b * jnp.uint32(rows_per_batch) + j * jnp.uint32(tile_rows) + r
            bits = _hash_u32((row * jnp.uint32(lane) + c)
                             ^ _hash_u32(seed_ref[0].astype(jnp.uint32)))
        # keep iff bits >= p * 2^32 (raw-u32 threshold; effective p is off by < 2^-32)
        thresh = jnp.uint32(min(int(round(dropout_p * 4294967296.0)), 4294967295))
        scale = jnp.asarray(1.0 / (1.0 - dropout_p), x.dtype)
        y = jnp.where(bits >= thresh, y * scale, jnp.zeros((), x.dtype))

    o_ref[...] = y


_PER_BUFFER_BYTES = 2 * 1024 * 1024      # x/pe/out, double-buffered: 6 bufs ~= 12 MiB
_VMEM_LIMIT_BYTES = 32 * 1024 * 1024     # fits v5e/v6e (128 MiB) and v7x (64 MiB)


def _lane_width(numel):
    """Largest multiple of 128 (<= 2048) dividing numel, or 0 if none exists."""
    cap = min(numel, 2048)
    for lanes in range(cap - cap % 128, 127, -128):
        if numel % lanes == 0:
            return lanes
    return 0


def positional_encoding(x, pe, *, dropout_p=0.1, seed=0, use_hw_prng=None):
    """x: (B, S, D); pe: (max_len, D), any float dtype.  Returns dropout(x + pe[:S])."""
    B, S, D = x.shape
    max_len = pe.shape[0]
    assert pe.shape[1] == D and S <= max_len

    if use_hw_prng is None:
        use_hw_prng = jax.default_backend() == "tpu"
    if dropout_p > 0.0 and not use_hw_prng:
        assert B * S * D < 2**32, "fallback PRNG counter would wrap"

    # --- lane-dense 2-D view; contiguous reshapes are free layout plumbing ---
    if D % 128 == 0:
        lane, rows = D, S
        x2, pe2, pe_rows = x, pe, max_len
    else:
        lane = _lane_width(S * D)
        if lane:
            rows = (S * D) // lane
            x2 = x.reshape(B, rows, lane)
            if (max_len * D) % lane == 0:
                pe2 = pe.reshape(-1, lane)          # free; reads limited by index_map
                pe_rows = pe2.shape[0]
            else:
                pe2 = pe.reshape(-1)[: rows * lane].reshape(rows, lane)
                pe_rows = rows
        else:                                        # S*D not a multiple of 128
            lane, rows = D, S
            x2, pe2, pe_rows = x, pe, max_len

    # --- tile rows from the VMEM budget, aligned to the packed sublane multiple ---
    itemsize = jnp.dtype(x.dtype).itemsize
    sublane = max(8, 32 // itemsize)                 # f32:8  bf16:16  int8/fp8:32
    tr = max(sublane, (_PER_BUFFER_BYTES // (lane * itemsize)) // sublane * sublane)
    if tr >= rows:
        tr = rows                                    # single full-extent row block
        if rows % sublane != 0 and rows != pe_rows:
            # tiny-sequence corner: pe block must equal its full dims -> small copy
            pe2, pe_rows = pe2[:rows], rows

    grid = (pl.cdiv(rows, tr), B)                    # batch innermost -> pe stays resident
    seed_arr = jnp.asarray([seed], dtype=jnp.int32)
    kernel = functools.partial(
        pos_enc_kernel, dropout_p=float(dropout_p), rows_per_batch=rows,
        tile_rows=tr, lane=lane, use_hw_prng=bool(use_hw_prng))

    out2 = pl.pallas_call(
        kernel,
        out_shape=jax.ShapeDtypeStruct((B, rows, lane), x.dtype),
        grid_spec=pltpu.PrefetchScalarGridSpec(
            num_scalar_prefetch=1,                   # seed lands in SMEM
            grid=grid,
            in_specs=[
                pl.BlockSpec((None, tr, lane), lambda j, b, seed: (b, j, 0)),  # x tile
                pl.BlockSpec((tr, lane), lambda j, b, seed: (j, 0)),           # pe tile
            ],
            out_specs=pl.BlockSpec((None, tr, lane), lambda j, b, seed: (b, j, 0)),
        ),
        compiler_params=pltpu.CompilerParams(
            # Every (row_block, batch) tile is independent (pure elementwise, no
            # accumulation), so both axes are safely "parallel" (v7x megacore);
            # batch innermost keeps the pe tile resident within each core's chunk.
            dimension_semantics=("parallel", "parallel"),
            vmem_limit_bytes=_VMEM_LIMIT_BYTES,
        ),
        # TODO(synk): expose input_output_aliases={1: 0} for callers that donate x.
    )(seed_arr, x2, pe2)

    return out2.reshape(B, S, D)


if __name__ == "__main__":
    B, S, D = 2, 8, 32            # small shapes consistent with the module
    MAX_LEN = 50000               # module default

    key = jax.random.PRNGKey(0)
    x = jax.random.normal(key, (B, S, D), dtype=jnp.float32)
    pe = make_positional_encoding(MAX_LEN, D)

    # Eval-mode correctness (dropout off) vs. the plain-JAX reference.
    out_nodrop = positional_encoding(x, pe, dropout_p=0.0)
    ref = x + pe[:S][None, :, :]
    np.testing.assert_allclose(np.asarray(out_nodrop), np.asarray(ref),
                               rtol=1e-6, atol=1e-6)

    # Training-mode forward (dropout p=0.1, deterministic seed).
    out = positional_encoding(x, pe, dropout_p=0.1, seed=42)
    jax.block_until_ready(out)

    # Structural dropout check: every element is either 0 or (x+pe)/(1-p),
    # and the drop count is plausible for p=0.1.
    y = np.asarray(out)
    scaled = np.asarray(ref) * np.float32(1.0 / 0.9)
    ok = np.isclose(y, 0.0, atol=1e-6) | np.isclose(y, scaled, rtol=1e-5, atol=1e-6)
    assert ok.all(), "dropout output is not in {0, (x+pe)/keep}"
    n_zero = int((y == 0.0).sum())
    assert 0 < n_zero < y.size // 2, f"implausible drop count: {n_zero}/{y.size}"

    print("KERNEL_OK")
</pallas_src>

<mosaic_0001>
module attributes {stable_mosaic.version = 11 : i64} {
  func.func @pos_enc_kernel(%arg0: i32, %arg1: i32, %arg2: memref<1xi32, #tpu.memory_space<smem>>, %arg3: memref<1x1x256xf32, #tpu.memory_space<vmem>>, %arg4: memref<1x256xf32, #tpu.memory_space<vmem>>, %arg5: memref<1x1x256xf32, #tpu.memory_space<vmem>>) attributes {dimension_semantics = [#tpu.dimension_semantics<parallel>, #tpu.dimension_semantics<parallel>], iteration_bounds = array<i64: 1, 2>, scalar_prefetch = 1 : i64, scratch_operands = 0 : i64, tpu.core_type = #tpu.core_type<tc>, window_params = [{transform_indices = @transform_0, window_bounds = array<i64: 1, 1, 256>}, {transform_indices = @transform_1, window_bounds = array<i64: 1, 256>}, {transform_indices = @transform_2, window_bounds = array<i64: 1, 1, 256>}]} {
    %c0 = arith.constant 0 : index
    %c0_0 = arith.constant 0 : index
    %c0_1 = arith.constant 0 : index
    %0 = vector.load %arg3[%c0, %c0_0, %c0_1] : memref<1x1x256xf32, #tpu.memory_space<vmem>>, vector<1x1x256xf32>
    %1 = vector.shape_cast %0 : vector<1x1x256xf32> to vector<1x256xf32>
    %c0_2 = arith.constant 0 : index
    %c0_3 = arith.constant 0 : index
    %2 = vector.load %arg4[%c0_2, %c0_3] : memref<1x256xf32, #tpu.memory_space<vmem>>, vector<1x256xf32>
    %3 = arith.addf %1, %2 : vector<1x256xf32>
    %c0_4 = arith.constant 0 : index
    %c0_5 = arith.constant 0 : index
    %c0_6 = arith.constant 0 : index
    %4 = vector.load %arg5[%c0_4, %c0_5, %c0_6] : memref<1x1x256xf32, #tpu.memory_space<vmem>>, vector<1x1x256xf32>
    %5 = vector.shape_cast %4 : vector<1x1x256xf32> to vector<1x256xf32>
    %6 = vector.shape_cast %3 : vector<1x256xf32> to vector<1x1x256xf32>
    tpu.vector_store %arg5[%c0_4, %c0_5, %c0_6], %6 {strides = array<i32>} : memref<1x1x256xf32, #tpu.memory_space<vmem>>, vector<1x1x256xf32>,
    return
  }
  func.func @transform_0(%arg0: i32, %arg1: i32, %arg2: memref<1xi32, #tpu.memory_space<smem>>) -> (i32, i32, i32) {
    %c0_i32 = arith.constant 0 : i32
    %c0_i32_0 = arith.constant 0 : i32
    return %arg1, %arg0, %c0_i32 : i32, i32, i32
  }
  func.func @transform_1(%arg0: i32, %arg1: i32, %arg2: memref<1xi32, #tpu.memory_space<smem>>) -> (i32, i32) {
    %c0_i32 = arith.constant 0 : i32
    %c0_i32_0 = arith.constant 0 : i32
    return %arg0, %c0_i32 : i32, i32
  }
  func.func @transform_2(%arg0: i32, %arg1: i32, %arg2: memref<1xi32, #tpu.memory_space<smem>>) -> (i32, i32, i32) {
    %c0_i32 = arith.constant 0 : i32
    %c0_i32_0 = arith.constant 0 : i32
    return %arg1, %arg0, %c0_i32 : i32, i32, i32
  }
}

</mosaic_0001>

<bundles_post_ra>
// kernel: tpu_custom_call.1
= control target key start
LH: loop header
LB: loop body
LE: loop exit
PB: predicated region body
PF: predicated region fallthrough
CT: control target
= control target key end

     0   :  { %9 = vsyncpa [#allocation5], 0  ;;  %s712_s0 = inlined_call_operand.<no memory space> [shape: s32[1], index: 0, kind: input, shape index: {}]   ;;  %s713_s1 = inlined_call_operand.hbm [shape: f32[2,1,256], index: 1, kind: input, shape index: {}]   ;;  %s714_s2 = inlined_call_operand.vmem [shape: f32[1,256], index: 2, kind: input, shape index: {}]   ;;  %s715_s3 = inlined_call_operand.hbm [shape: f32[2,1,256], index: 3, kind: output, shape index: {}]  }
   0x1   :  { %11 = vsyncpa [#allocation5 + $0x1], 0 }
   0x2   :  { %12 = vsyncpa [#allocation6], 0 }
   0x3   :  { %14 = vsyncpa [#allocation6 + $0x1], 0  ;;  %s537_s12 = smov 0   ;;  %s539_s13 = smov 0  }
   0x4   :  { %s541_s14 = smov 0   ;;  %s543_s0 = smov 0  }
   0x5   :  { %s545_s15 = smov 0   ;;  %s547_s16 = smov 0  }
   0x6 LB: > { %s321_s17 = sadd.s32 4294967295, %s513_s16   ;;  %s322_s18 = sadd.s32 4294967294, %s513_s16   ;;  %s513_s16 = sphi %s547_s16, %s20_s16   ;;  %s509_s15 = sphi %s545_s15, %s731_s15   ;;  %s505_s0 = sphi %s543_s0, %s730_s0   ;;  %s501_s14 = sphi %s541_s14, %s729_s14   ;;  %s497_s13 = sphi %s539_s13, %s728_s13   ;;  %s493_s12 = sphi %s537_s12, %s727_s12  }
   0x7   : > { %s29_s19 = sadd.s32 1, %s509_s15  ;;  %s41_s20 = sadd.s32 1, %s501_s14 }
   0x8   : > { %p30_p0 = scmp.ge.s32.totalorder %s29_s19, 2  ;;  %p48_p1 = scmp.ne.s32.totalorder %s501_s14, %s497_s13 }
   0x9   : > { %p49_p2 = scmp.eq.s32.totalorder %s513_s16, 0  ;;  %p54_p3 = scmp.ne.s32.totalorder %s497_s13, %s493_s12 }
   0xa   : > { %s733_s19 = smov (%p30_p0, %s29_s19), 0  ;;  %p55_p5 = scmp.eq.s32.totalorder %s321_s17, 0 }
   0xb   : > { %p578_p4 = por %p49_p2, %p48_p1  ;;  %s36_s22 = ssub.s32 %s509_s15, %s733_s19 }
   0xc   : > { %p106_p6 = scmp.eq.s32.totalorder %s321_s17, 1  ;;  %p39_p7 = scmp.eq.s32.totalorder %s36_s22, 0 }
   0xd   : > { %p584_p8 = por %p55_p5, %p54_p3  ;;  %p112_p10 = scmp.eq.s32.totalorder %s322_s18, 1 }
   0xe   : > { %p588_p9 = por %p106_p6, %p48_p1  ;;  %p351_p13 = scmp.lt.s32.totalorder %s513_s16, 2 }
   0xf   : > { %s593_s25 = scalar_select %p39_p7, %s501_s14, %s41_s20  }
  0x10   : > { %s719_s24 = scalar_select %p588_p9, 1, 0 }
  0x11   : > { %p595_p11 = por %p112_p10, %p54_p3  ;;  %s139_s27 = sand.u32 1, %s501_s14  }
  0x12   : > { %s326_s28 = sshll.u32 %s139_s27, 1  ;;  %s337_s29 = sshll.u32 %s509_s15, 5 }
  0x13   : > { %s720_s26 = scalar_select %p595_p11, 1, 0 }
  0x14   : > { %s606_s5 = scalar_lea.hbm %s713_s1, %s337_s29  ;;  %s143_s6 = scalar_lea.vmem [#allocation4], %s326_s28 }
  0x15   : > { %s153_s7 = sshll.u32 %s143_s6, 4  ;;  %p612_p0 = pnand %p351_p13, %p578_p4  ;;  %s608_s7 = int_to_ptr.vmem [resolvable:$true] %s153_s7 }
  0x16   : > { %s140_s9 = scalar_lea.sflag [#allocation5], %s139_s27  ;;  %s401_s10 = scalar_lea.hbm %s606_s5, 32 }
  0x17   : > { %p402_p3 = scmp.ne.s32.totalorder %s606_s5, %s401_s10  ;;  %p403_p5 = pneg %p612_p0 }
  0x18   : > { %s406_s18 = scalar_lea.hbm %s713_s1, 64  ;;  %p407_p4 = scmp.lt.u32.totalorder %s606_s5, %s713_s1 }
  0x19   : > { %p404_p6 = pnand %p403_p5, %p402_p3  ;;  %p408_p10 = scmp.lt.u32.totalorder %s406_s18, %s401_s10 }
  0x1a   : > { %p410_p12 = scmp.lt.u32.totalorder %s401_s10, %s606_s5 }
  0x1b   : > { %p405_p7 = pneg %p404_p6  ;;  %p409_p13 = por %p408_p10, %p407_p4 }
  0x1d   : > { %p411_p1 = por %p410_p12, %p409_p13 }
  0x1f   : > { %p412_p2 = pnand %p411_p1, %p405_p7 }
  0x21   : > { %415 = shalt.err (!%p412_p2)
}
  0x22   : > { %s416_s22 = scalar_lea.vmem %s608_s7, 32  ;;  %s515_s27 = smov [#allocation4]  }
  0x23   : > { %p417_p3 = scmp.ne.s32.totalorder %s608_s7, %s416_s22  ;;  %s421_s28 = sshll.u32 %s515_s27, 4  ;;  %s422_s28 = int_to_ptr.vmem [resolvable:$false] %s421_s28 }
  0x24   : > { %s423_s29 = scalar_lea.vmem %s422_s28, 64  ;;  %p424_p9 = scmp.lt.s32.totalorder %s608_s7, %s422_s28 }
  0x25   : > { %p419_p6 = pnand %p417_p3, %p403_p5  ;;  %p425_p4 = scmp.lt.s32.totalorder %s423_s29, %s416_s22 }
  0x27   : > { %p420_p11 = pneg %p419_p6  ;;  %p426_p10 = por %p425_p4, %p424_p9 }
  0x29   : > { %p427_p12 = pnand %p426_p10, %p420_p11 }
  0x2b   : > { %430 = shalt.err (!%p427_p12)
}
  0x2c   : > { %346 = dma.hbm_to_vmem [thread:$0]  (!%p612_p0), %s606_s5, 32, %s608_s7, %s140_s9  }
  0x2d   : > { %p722_p1 = scmp.lt.s32.totalorder %s513_s16, 3  ;;  %p723_p2 = scmp.ge.s32.totalorder %s513_s16, 1 }
  0x2f   : > { %p159_p5 = pnand %p723_p2, %p722_p1 }
  0x30   : > { %s648_s30 = sand.u32 (!%p159_p5), 1, %s497_s13  }
  0x31   : > { %162 = sbr.rel (%p159_p5) target bundleno = 83 (0x53), region = 28  ;;  %s330_s4 = sshll.u32 (!%p159_p5), %s648_s30, 1 }
  0x32   : > { %s165_s6 = scalar_lea.sflag (!%p159_p5), [#allocation5], %s648_s30  ;;  %s168_s10 = scalar_lea.vmem (!%p159_p5), [#allocation4], %s330_s4 }
  0x38   : > { %484 = dma.done.wait (%p584_p8), %s165_s6, 32  }
  0x39   : > { %486 = vsyncadd (%p584_p8), %s165_s6, 4294967264  ;;  %v200_v0 = vlaneseq  ;;  %s192_s5 = scalar_lea.vmem [#allocation7], %s330_s4  ;;  %s338_s8 = sshll.u32 %s505_s0, 5  ;;  %v197_v1 = vld [vmem:[%s168_s10] sm:$0x3] }
  0x3a   : > { %s222_s7 = sshll.u32 %s192_s5, 4  ;;  %v198_v2 = vld [vmem:[%s714_s2] sm:$0x3]  ;;  %s665_s23 = scalar_lea.hbm %s715_s3, %s338_s8  ;;  %s660_s7 = int_to_ptr.vmem [resolvable:$true] %s222_s7 }
  0x3b   : > { %vm202_vm0 = vcmp.lt.s32.totalorder %v200_v0, 256  ;;  %v199_v3 = vadd.f32 %v198_v2, %v197_v1  ;;  %s206_s20 = scalar_lea.sflag [#allocation6], %s648_s30  ;;  %s431_s0 = scalar_lea.vmem %s660_s7, 32 }
  0x3c   : > { %p432_p8 = scmp.ne.s32.totalorder %s660_s7, %s431_s0  ;;  %p724_p9 = scmp.ne.s32.totalorder %s719_s24, 0 }
  0x3d   : > { %204 = vst.msk [vmem:[%s192_s5] sm:$0x3] %vm202_vm0, %v199_v3  ;;  %s516_s21 = smov [#allocation7]  }
  0x3e   : > { %p433_p11 = pnand %p432_p8, %p724_p9  ;;  %s435_s22 = sshll.u32 %s516_s21, 4  ;;  %s436_s22 = int_to_ptr.vmem [resolvable:$false] %s435_s22 }
  0x3f   : > { %s437_s27 = scalar_lea.vmem %s436_s22, 64  ;;  %p438_p7 = scmp.lt.s32.totalorder %s660_s7, %s436_s22 }
  0x40   : > { %p434_p0 = pneg %p433_p11  ;;  %p439_p13 = scmp.lt.s32.totalorder %s437_s27, %s431_s0 }
  0x42   : > { %p440_p3 = por %p439_p13, %p438_p7 }
  0x44   : > { %p441_p6 = pnand %p440_p3, %p434_p0 }
  0x46   : > { %444 = shalt.err (!%p441_p6)
}
  0x47   : > { %s445_s28 = scalar_lea.hbm %s665_s23, 32  ;;  %s449_s4 = scalar_lea.hbm %s715_s3, 64 }
  0x48   : > { %p446_p4 = scmp.ne.s32.totalorder %s665_s23, %s445_s28  ;;  %p450_p1 = scmp.lt.u32.totalorder %s665_s23, %s715_s3 }
  0x49   : > { %p451_p2 = scmp.lt.u32.totalorder %s449_s4, %s445_s28  ;;  %p453_p8 = scmp.lt.u32.totalorder %s445_s28, %s665_s23 }
  0x4a   : > { %p447_p10 = pnand %p446_p4, %p724_p9 }
  0x4b   : > { %p452_p5 = por %p451_p2, %p450_p1 }
  0x4c   : > { %p448_p12 = pneg %p447_p10 }
  0x4d   : > { %p454_p11 = por %p453_p8, %p452_p5 }
  0x4f   : > { %p455_p0 = pnand %p454_p11, %p448_p12 }
  0x51   : > { %458 = shalt.err (!%p455_p0)
}
  0x52   : > { %341 = dma.vmem_to_hbm [thread:$0]  (%p724_p9), %s660_s7, 32, %s665_s23, %s206_s20  }
  0x53 PF: > { %s234_s5 = sand.u32 1, %s493_s12   ;;  %p725_p7 = scmp.ne.s32.totalorder %s720_s26, 0 }
  0x54   : > { %p726_p13 = scmp.ge.s32.totalorder %s513_s16, 2  ;;  %s235_s8 = scalar_lea.sflag [#allocation6], %s234_s5 }
  0x56   : > { %p348_p3 = pnand %p726_p13, %p725_p7 }
  0x58   : > { %488 = dma.done.wait (!%p348_p3), %s235_s8, 32  }
  0x59   : > { %490 = vsyncadd (!%p348_p3), %s235_s8, 4294967264  ;;  %s20_s16 = sadd.s32 1, %s513_s16   ;;  %s727_s12 = smov %s497_s13 }
  0x5a   : > { %p17_p6 = scmp.ge.s32.totalorder %s20_s16, 4   ;;  %s728_s13 = smov %s501_s14 }
  0x5b   : > { %s729_s14 = smov %s593_s25  ;;  %s730_s0 = smov %s509_s15 }
  0x5c   : > { %s731_s15 = smov %s733_s19  ;;  %19 = sbr.rel (!%p17_p6) target bundleno = 6 (0x6), region = 76 }
  0x63   :  { %240 = vsyncpa [#allocation5], 1 }
  0x64   :  { %242 = vsyncpa [#allocation5 + $0x1], 1 }
  0x65   :  { %243 = vsyncpa [#allocation6], 1 }
  0x66   :  { %245 = vsyncpa [#allocation6 + $0x1], 1 }

</bundles_post_ra>
